<compile_context>
chip_gen: v6e
topology: v6e:2x2x1
jax: 0.10.0
libtpu: 0.0.40
codegen_flags: <defaults>
</compile_context>

<pallas_src>
import functools

import jax
import jax.numpy as jnp
from jax.experimental import pallas as pl
from jax.experimental.pallas import tpu as pltpu


# ---------------------------------------------------------------------------
# Kernel 1: tiled global average pool (sum accumulation over HW tiles).
#   grid = (num_hw_tiles,)  -- "arbitrary" (output block is an accumulator)
# ---------------------------------------------------------------------------
def _pool_kernel(xl_ref, xr_ref, sl_ref, sr_ref):
    t = pl.program_id(0)

    @pl.when(t == 0)
    def _():
        sl_ref[...] = jnp.zeros_like(sl_ref)
        sr_ref[...] = jnp.zeros_like(sr_ref)

    # Lane reduction over the HW tile; accumulate in fp32.
    sl_ref[...] += jnp.sum(xl_ref[...].astype(jnp.float32), axis=-1)
    sr_ref[...] += jnp.sum(xr_ref[...].astype(jnp.float32), axis=-1)


# ---------------------------------------------------------------------------
# Kernel 2: streaming channel gate  out = x * scale, scale = 1 + sigmoid(mlp).
#   grid = (batch, num_hw_tiles)  -- both "parallel"
# ---------------------------------------------------------------------------
def _gate_kernel(sl_ref, sr_ref, xl_ref, xr_ref, outl_ref, outr_ref):
    # sl/sr: (1, c, 1) in x dtype; xl/xr: (1, c, hw_tile).  Lane broadcast.
    outl_ref[...] = xl_ref[...] * sl_ref[...]
    outr_ref[...] = xr_ref[...] * sr_ref[...]


# ---------------------------------------------------------------------------
# Helpers
# ---------------------------------------------------------------------------
def _round_up(x, m):
    return (x + m - 1) // m * m


def _pick_tile(padded_hw, block_rows, itemsize, n_bufs, budget=24 << 20):
    """Largest lane tile (multiple of 128) dividing padded_hw that keeps
    n_bufs double-buffered blocks under a conservative VMEM budget."""
    for cand in (2048, 1024, 512, 256, 128):
        if padded_hw % cand == 0 and block_rows * cand * itemsize * n_bufs <= budget:
            return cand
    return 128


def _pooled_sums(xl3, xr3, hw_tile):
    b, c, padded_hw = xl3.shape
    n_t = padded_hw // hw_tile
    itemsize = jnp.dtype(xl3.dtype).itemsize
    x_spec = pl.BlockSpec((b, c, hw_tile), lambda t: (0, 0, t))
    s_spec = pl.BlockSpec((b, c), lambda t: (0, 0))  # resident accumulator
    return pl.pallas_call(
        _pool_kernel,
        out_shape=(jax.ShapeDtypeStruct((b, c), jnp.float32),
                   jax.ShapeDtypeStruct((b, c), jnp.float32)),
        grid_spec=pltpu.PrefetchScalarGridSpec(
            num_scalar_prefetch=0,
            grid=(n_t,),
            in_specs=[x_spec, x_spec],
            out_specs=(s_spec, s_spec)),
        compiler_params=pltpu.CompilerParams(
            dimension_semantics=("arbitrary",),
            vmem_limit_bytes=32 * 1024 * 1024),
        cost_estimate=pl.CostEstimate(
            flops=2 * b * c * padded_hw,
            transcendentals=0,
            bytes_accessed=2 * b * c * padded_hw * itemsize),
    )(xl3, xr3)


def _apply_gates(xl3, xr3, scale_l, scale_r, hw_tile):
    b, c, padded_hw = xl3.shape
    n_t = padded_hw // hw_tile
    itemsize = jnp.dtype(xl3.dtype).itemsize
    x_spec = pl.BlockSpec((1, c, hw_tile), lambda i, t: (i, 0, t))
    s_spec = pl.BlockSpec((1, c, 1), lambda i, t: (i, 0, 0))
    return pl.pallas_call(
        _gate_kernel,
        out_shape=(jax.ShapeDtypeStruct((b, c, padded_hw), xl3.dtype),
                   jax.ShapeDtypeStruct((b, c, padded_hw), xr3.dtype)),
        grid_spec=pltpu.PrefetchScalarGridSpec(
            num_scalar_prefetch=0,
            grid=(b, n_t),
            in_specs=[s_spec, s_spec, x_spec, x_spec],
            out_specs=(x_spec, x_spec)),
        compiler_params=pltpu.CompilerParams(
            dimension_semantics=("parallel", "parallel"),
            vmem_limit_bytes=32 * 1024 * 1024),
        cost_estimate=pl.CostEstimate(
            flops=2 * b * c * padded_hw,
            transcendentals=0,
            bytes_accessed=4 * b * c * padded_hw * itemsize),
    )(scale_l, scale_r, xl3, xr3)


def _channel_scales(pooled, w1, w2, w3, out_dtype):
    """pooled: (b, c) fp32.  w1,(c,c) w2,(c//r,c) w3,(c,c//r) in PyTorch (out,in).
    Returns (1 + sigmoid(relu(pooled @ (w2@w1).T) @ w3.T)) cast to out_dtype.
    fc1·fc2 are composed exactly (no activation between them in the module)."""
    w12 = jnp.dot(w2, w1).T                                   # (c, c//r)
    y = jnp.dot(pooled, w12, preferred_element_type=jnp.float32)
    y = jnp.maximum(y, 0.0)
    y = jnp.dot(y, w3.T, preferred_element_type=jnp.float32)
    return (1.0 + jax.nn.sigmoid(y)).astype(out_dtype)


# ---------------------------------------------------------------------------
# Forward
# ---------------------------------------------------------------------------
def bica_forward(xl, xr, params):
    """xl, xr: (b, c, h, w).  Returns (out_l, out_r) with the same shape."""
    b, c, h, w = xl.shape
    hw = h * w
    padded_hw = _round_up(hw, 128)            # lane-dense stores

    xl3 = xl.reshape(b, c, hw)
    xr3 = xr.reshape(b, c, hw)
    if padded_hw != hw:
        pad = [(0, 0), (0, 0), (0, padded_hw - hw)]
        xl3 = jnp.pad(xl3, pad)               # zero pad -> sums unaffected
        xr3 = jnp.pad(xr3, pad)

    itemsize = jnp.dtype(xl.dtype).itemsize
    pool_tile = _pick_tile(padded_hw, b * c, itemsize, n_bufs=4)   # 2 in x 2 bufs
    gate_tile = _pick_tile(padded_hw, c, itemsize, n_bufs=8)       # (2 in + 2 out) x 2

    # Pass 1: pooled sums (Pallas, tiled reduction), divide by true HW.
    sum_l, sum_r = _pooled_sums(xl3, xr3, pool_tile)
    inv_hw = 1.0 / float(hw)
    pooled_l = sum_l * inv_hw
    pooled_r = sum_r * inv_hw

    # Tiny pooled MLPs in plain XLA (hoisted off the mem-bound critical path).
    # fc(pool(xr)) scales xl;  fc2(pool(xl)) scales xr.
    scale_l = _channel_scales(pooled_r, params["fc1"], params["fc2"],
                              params["fc3"], xl.dtype)
    scale_r = _channel_scales(pooled_l, params["g1"], params["g2"],
                              params["g3"], xr.dtype)

    # Pass 2: streaming gate (Pallas, tiled, lane-dense).
    out_l, out_r = _apply_gates(xl3, xr3,
                                scale_l.reshape(b, c, 1),
                                scale_r.reshape(b, c, 1),
                                gate_tile)
    out_l = out_l[:, :, :hw].reshape(b, c, h, w)
    out_r = out_r[:, :, :hw].reshape(b, c, h, w)
    return out_l, out_r


# ---------------------------------------------------------------------------
# Reference + test harness
# ---------------------------------------------------------------------------
def _init_linear(key, out_f, in_f):
    bound = 1.0 / (in_f ** 0.5)
    return jax.random.uniform(key, (out_f, in_f), jnp.float32, -bound, bound)


def _reference(xl, xr, params):
    """Pure-JAX reference mirroring the PyTorch forward exactly."""
    def fc(y, w1, w2, w3):
        y = y @ w1.T
        y = jnp.maximum(y @ w2.T, 0.0)
        return jax.nn.sigmoid(y @ w3.T)

    b, c, _, _ = xr.shape
    y = jnp.mean(xr, axis=(2, 3))
    y = fc(y, params["fc1"], params["fc2"], params["fc3"]).reshape(b, c, 1, 1)
    out_l = xl * y + xl
    z = jnp.mean(xl, axis=(2, 3))
    z = fc(z, params["g1"], params["g2"], params["g3"]).reshape(b, c, 1, 1)
    out_r = xr * z + xr
    return out_l, out_r


if __name__ == "__main__":
    batch, channel, reduction, H, W = 2, 32, 16, 16, 16
    cr = channel // reduction

    key = jax.random.PRNGKey(0)
    kxl, kxr, k1, k2, k3, k4, k5, k6 = jax.random.split(key, 8)

    xl = jax.random.normal(kxl, (batch, channel, H, W), jnp.float32)
    xr = jax.random.normal(kxr, (batch, channel, H, W), jnp.float32)

    params = {
        "fc1": _init_linear(k1, channel, channel),   # Linear(c, c)
        "fc2": _init_linear(k2, cr, channel),        # Linear(c, c//r)
        "fc3": _init_linear(k3, channel, cr),        # Linear(c//r, c)
        "g1": _init_linear(k4, channel, channel),
        "g2": _init_linear(k5, cr, channel),
        "g3": _init_linear(k6, channel, cr),
    }

    out_l, out_r = jax.jit(bica_forward)(xl, xr, params)
    jax.block_until_ready((out_l, out_r))

    ref_l, ref_r = _reference(xl, xr, params)
    assert jnp.allclose(out_l, ref_l, atol=1e-5, rtol=1e-5)
    assert jnp.allclose(out_r, ref_r, atol=1e-5, rtol=1e-5)

    print("KERNEL_OK")
</pallas_src>

<mosaic_0001>
module attributes {stable_mosaic.version = 11 : i64} {
  func.func @_pool_kernel(%arg0: i32, %arg1: memref<2x32x256xf32, #tpu.memory_space<vmem>>, %arg2: memref<2x32x256xf32, #tpu.memory_space<vmem>>, %arg3: memref<2x32xf32, #tpu.memory_space<vmem>>, %arg4: memref<2x32xf32, #tpu.memory_space<vmem>>) attributes {dimension_semantics = [#tpu.dimension_semantics<arbitrary>], iteration_bounds = array<i64: 1>, scalar_prefetch = 0 : i64, scratch_operands = 0 : i64, tpu.core_type = #tpu.core_type<tc>, window_params = [{transform_indices = @transform_0, window_bounds = array<i64: 2, 32, 256>}, {transform_indices = @transform_1, window_bounds = array<i64: 2, 32, 256>}, {pipeline_mode = #tpu.pipeline_mode<synchronous>, transform_indices = @transform_2, window_bounds = array<i64: 2, 32>}, {pipeline_mode = #tpu.pipeline_mode<synchronous>, transform_indices = @transform_3, window_bounds = array<i64: 2, 32>}]} {
    %c0_i32 = arith.constant 0 : i32
    %0 = arith.cmpi eq, %arg0, %c0_i32 : i32
    %1 = arith.extui %0 : i1 to i32
    %c0_i32_0 = arith.constant 0 : i32
    %2 = arith.cmpi ne, %1, %c0_i32_0 : i32
    scf.if %2 {
      %cst_15 = arith.constant 0.000000e+00 : f32
      %13 = vector.broadcast %cst_15 : f32 to vector<2x32xf32>
      %c0_16 = arith.constant 0 : index
      %c0_17 = arith.constant 0 : index
      %14 = vector.load %arg3[%c0_16, %c0_17] : memref<2x32xf32, #tpu.memory_space<vmem>>, vector<2x32xf32>
      tpu.vector_store %arg3[%c0_16, %c0_17], %13 {strides = array<i32>} : memref<2x32xf32, #tpu.memory_space<vmem>>, vector<2x32xf32>,
      %cst_18 = arith.constant 0.000000e+00 : f32
      %15 = vector.broadcast %cst_18 : f32 to vector<2x32xf32>
      %c0_19 = arith.constant 0 : index
      %c0_20 = arith.constant 0 : index
      %16 = vector.load %arg4[%c0_19, %c0_20] : memref<2x32xf32, #tpu.memory_space<vmem>>, vector<2x32xf32>
      tpu.vector_store %arg4[%c0_19, %c0_20], %15 {strides = array<i32>} : memref<2x32xf32, #tpu.memory_space<vmem>>, vector<2x32xf32>,
    } else {
    }
    %c0 = arith.constant 0 : index
    %c0_1 = arith.constant 0 : index
    %3 = vector.load %arg3[%c0, %c0_1] : memref<2x32xf32, #tpu.memory_space<vmem>>, vector<2x32xf32>
    %c0_2 = arith.constant 0 : index
    %c0_3 = arith.constant 0 : index
    %c0_4 = arith.constant 0 : index
    %4 = vector.load %arg1[%c0_2, %c0_3, %c0_4] : memref<2x32x256xf32, #tpu.memory_space<vmem>>, vector<2x32x256xf32>
    %cst = arith.constant dense<0.000000e+00> : vector<2x32xf32>
    %5 = vector.multi_reduction <add>, %4, %cst [2] : vector<2x32x256xf32> to vector<2x32xf32>
    %6 = arith.addf %3, %5 : vector<2x32xf32>
    %c0_5 = arith.constant 0 : index
    %c0_6 = arith.constant 0 : index
    %7 = vector.load %arg3[%c0_5, %c0_6] : memref<2x32xf32, #tpu.memory_space<vmem>>, vector<2x32xf32>
    tpu.vector_store %arg3[%c0_5, %c0_6], %6 {strides = array<i32>} : memref<2x32xf32, #tpu.memory_space<vmem>>, vector<2x32xf32>,
    %c0_7 = arith.constant 0 : index
    %c0_8 = arith.constant 0 : index
    %8 = vector.load %arg4[%c0_7, %c0_8] : memref<2x32xf32, #tpu.memory_space<vmem>>, vector<2x32xf32>
    %c0_9 = arith.constant 0 : index
    %c0_10 = arith.constant 0 : index
    %c0_11 = arith.constant 0 : index
    %9 = vector.load %arg2[%c0_9, %c0_10, %c0_11] : memref<2x32x256xf32, #tpu.memory_space<vmem>>, vector<2x32x256xf32>
    %cst_12 = arith.constant dense<0.000000e+00> : vector<2x32xf32>
    %10 = vector.multi_reduction <add>, %9, %cst_12 [2] : vector<2x32x256xf32> to vector<2x32xf32>
    %11 = arith.addf %8, %10 : vector<2x32xf32>
    %c0_13 = arith.constant 0 : index
    %c0_14 = arith.constant 0 : index
    %12 = vector.load %arg4[%c0_13, %c0_14] : memref<2x32xf32, #tpu.memory_space<vmem>>, vector<2x32xf32>
    tpu.vector_store %arg4[%c0_13, %c0_14], %11 {strides = array<i32>} : memref<2x32xf32, #tpu.memory_space<vmem>>, vector<2x32xf32>,
    return
  }
  func.func @transform_0(%arg0: i32) -> (i32, i32, i32) {
    %c0_i32 = arith.constant 0 : i32
    %c0_i32_0 = arith.constant 0 : i32
    %c0_i32_1 = arith.constant 0 : i32
    return %c0_i32, %c0_i32_0, %arg0 : i32, i32, i32
  }
  func.func @transform_1(%arg0: i32) -> (i32, i32, i32) {
    %c0_i32 = arith.constant 0 : i32
    %c0_i32_0 = arith.constant 0 : i32
    %c0_i32_1 = arith.constant 0 : i32
    return %c0_i32, %c0_i32_0, %arg0 : i32, i32, i32
  }
  func.func @transform_2(%arg0: i32) -> (i32, i32) {
    %c0_i32 = arith.constant 0 : i32
    %c0_i32_0 = arith.constant 0 : i32
    %c0_i32_1 = arith.constant 0 : i32
    return %c0_i32, %c0_i32_0 : i32, i32
  }
  func.func @transform_3(%arg0: i32) -> (i32, i32) {
    %c0_i32 = arith.constant 0 : i32
    %c0_i32_0 = arith.constant 0 : i32
    %c0_i32_1 = arith.constant 0 : i32
    return %c0_i32, %c0_i32_0 : i32, i32
  }
}

module attributes {stable_mosaic.version = 11 : i64} {
  func.func @_gate_kernel(%arg0: i32, %arg1: i32, %arg2: memref<1x32x1xf32, #tpu.memory_space<vmem>>, %arg3: memref<1x32x1xf32, #tpu.memory_space<vmem>>, %arg4: memref<1x32x256xf32, #tpu.memory_space<vmem>>, %arg5: memref<1x32x256xf32, #tpu.memory_space<vmem>>, %arg6: memref<1x32x256xf32, #tpu.memory_space<vmem>>, %arg7: memref<1x32x256xf32, #tpu.memory_space<vmem>>) attributes {dimension_semantics = [#tpu.dimension_semantics<parallel>, #tpu.dimension_semantics<parallel>], iteration_bounds = array<i64: 2, 1>, scalar_prefetch = 0 : i64, scratch_operands = 0 : i64, tpu.core_type = #tpu.core_type<tc>, window_params = [{transform_indices = @transform_0, window_bounds = array<i64: 1, 32, 1>}, {transform_indices = @transform_1, window_bounds = array<i64: 1, 32, 1>}, {transform_indices = @transform_2, window_bounds = array<i64: 1, 32, 256>}, {transform_indices = @transform_3, window_bounds = array<i64: 1, 32, 256>}, {transform_indices = @transform_4, window_bounds = array<i64: 1, 32, 256>}, {transform_indices = @transform_5, window_bounds = array<i64: 1, 32, 256>}]} {
    %c0 = arith.constant 0 : index
    %c0_0 = arith.constant 0 : index
    %c0_1 = arith.constant 0 : index
    %0 = vector.load %arg4[%c0, %c0_0, %c0_1] : memref<1x32x256xf32, #tpu.memory_space<vmem>>, vector<1x32x256xf32>
    %c0_2 = arith.constant 0 : index
    %c0_3 = arith.constant 0 : index
    %c0_4 = arith.constant 0 : index
    %1 = vector.load %arg2[%c0_2, %c0_3, %c0_4] : memref<1x32x1xf32, #tpu.memory_space<vmem>>, vector<1x32x1xf32>
    %2 = vector.broadcast %1 : vector<1x32x1xf32> to vector<1x32x256xf32>
    %3 = arith.mulf %0, %2 : vector<1x32x256xf32>
    %c0_5 = arith.constant 0 : index
    %c0_6 = arith.constant 0 : index
    %c0_7 = arith.constant 0 : index
    %4 = vector.load %arg6[%c0_5, %c0_6, %c0_7] : memref<1x32x256xf32, #tpu.memory_space<vmem>>, vector<1x32x256xf32>
    tpu.vector_store %arg6[%c0_5, %c0_6, %c0_7], %3 {strides = array<i32>} : memref<1x32x256xf32, #tpu.memory_space<vmem>>, vector<1x32x256xf32>,
    %c0_8 = arith.constant 0 : index
    %c0_9 = arith.constant 0 : index
    %c0_10 = arith.constant 0 : index
    %5 = vector.load %arg5[%c0_8, %c0_9, %c0_10] : memref<1x32x256xf32, #tpu.memory_space<vmem>>, vector<1x32x256xf32>
    %c0_11 = arith.constant 0 : index
    %c0_12 = arith.constant 0 : index
    %c0_13 = arith.constant 0 : index
    %6 = vector.load %arg3[%c0_11, %c0_12, %c0_13] : memref<1x32x1xf32, #tpu.memory_space<vmem>>, vector<1x32x1xf32>
    %7 = vector.broadcast %6 : vector<1x32x1xf32> to vector<1x32x256xf32>
    %8 = arith.mulf %5, %7 : vector<1x32x256xf32>
    %c0_14 = arith.constant 0 : index
    %c0_15 = arith.constant 0 : index
    %c0_16 = arith.constant 0 : index
    %9 = vector.load %arg7[%c0_14, %c0_15, %c0_16] : memref<1x32x256xf32, #tpu.memory_space<vmem>>, vector<1x32x256xf32>
    tpu.vector_store %arg7[%c0_14, %c0_15, %c0_16], %8 {strides = array<i32>} : memref<1x32x256xf32, #tpu.memory_space<vmem>>, vector<1x32x256xf32>,
    return
  }
  func.func @transform_0(%arg0: i32, %arg1: i32) -> (i32, i32, i32) {
    %c0_i32 = arith.constant 0 : i32
    %c0_i32_0 = arith.constant 0 : i32
    %c0_i32_1 = arith.constant 0 : i32
    return %arg0, %c0_i32, %c0_i32_0 : i32, i32, i32
  }
  func.func @transform_1(%arg0: i32, %arg1: i32) -> (i32, i32, i32) {
    %c0_i32 = arith.constant 0 : i32
    %c0_i32_0 = arith.constant 0 : i32
    %c0_i32_1 = arith.constant 0 : i32
    return %arg0, %c0_i32, %c0_i32_0 : i32, i32, i32
  }
  func.func @transform_2(%arg0: i32, %arg1: i32) -> (i32, i32, i32) {
    %c0_i32 = arith.constant 0 : i32
    %c0_i32_0 = arith.constant 0 : i32
    return %arg0, %c0_i32, %arg1 : i32, i32, i32
  }
  func.func @transform_3(%arg0: i32, %arg1: i32) -> (i32, i32, i32) {
    %c0_i32 = arith.constant 0 : i32
    %c0_i32_0 = arith.constant 0 : i32
    return %arg0, %c0_i32, %arg1 : i32, i32, i32
  }
  func.func @transform_4(%arg0: i32, %arg1: i32) -> (i32, i32, i32) {
    %c0_i32 = arith.constant 0 : i32
    %c0_i32_0 = arith.constant 0 : i32
    return %arg0, %c0_i32, %arg1 : i32, i32, i32
  }
  func.func @transform_5(%arg0: i32, %arg1: i32) -> (i32, i32, i32) {
    %c0_i32 = arith.constant 0 : i32
    %c0_i32_0 = arith.constant 0 : i32
    return %arg0, %c0_i32, %arg1 : i32, i32, i32
  }
}

</mosaic_0001>

<bundles_post_ra>
// kernel: bica_forward.2
= control target key start
LH: loop header
LB: loop body
LE: loop exit
PB: predicated region body
PF: predicated region fallthrough
CT: control target
= control target key end

     0   :  { %vm17_vm0 = vcmask 254976   ;;  %v221_v48 = vmov 0.0   ;;  %v69_v53 = vlaneseq  ;;  %vm80_vm1 = vcmask 130112   ;;  %s374_s0 = inlined_call_operand.vmem [shape: f32[2,32,256], index: 0, kind: input, shape index: {}]   ;;  %s375_s1 = inlined_call_operand.vmem [shape: f32[2,32,256], index: 1, kind: input, shape index: {}]   ;;  %s376_s2 = inlined_call_operand.vmem [shape: f32[2,32], index: 2, kind: output, shape index: {0}]   ;;  %s377_s3 = inlined_call_operand.vmem [shape: f32[2,32], index: 3, kind: output, shape index: {1}]  }
   0x1   :  { %v29_v0 = vld [vmem:[%s374_s0 + $0x40] sm:$0xff]  ;;  %v30_v1 = vld [vmem:[%s374_s0 + $0x48] sm:$0xff]  ;;  %v31_v5 = vld [vmem:[%s374_s0 + $0x50] sm:$0xff]  ;;  %18 = vst.msk [vmem:[%s376_s2] sm:$0x3] %vm17_vm0, %v221_v48  ;;  %vm87_vm2 = vcmask 195712  }
   0x2   :  { %v21_v2 = vld [vmem:[%s374_s0] sm:$0xff]  ;;  %v49_v3 = vadd.f32 %v30_v1, %v29_v0  ;;  %v22_v4 = vld [vmem:[%s374_s0 + $0x8] sm:$0xff]  ;;  %v32_v6 = vld [vmem:[%s374_s0 + $0x58] sm:$0xff]  ;;  %19 = vst.msk [vmem:[%s377_s3] sm:$0x3] %vm17_vm0, %v221_v48  ;;  %v70_v56 = vand.u32 127, %v69_v53 }
   0x3   :  { %v37_v7 = vadd.f32 %v22_v4, %v21_v2  ;;  %v23_v8 = vld [vmem:[%s374_s0 + $0x10] sm:$0xff]  ;;  %v24_v9 = vld [vmem:[%s374_s0 + $0x18] sm:$0xff]  ;;  %v52_v10 = vadd.f32 %v32_v6, %v31_v5  ;;  %v122_v14 = vld [vmem:[%s375_s1] sm:$0xff]  ;;  %v72_v60 = vshrl.u32 %v69_v53, 7  ;;  %vm94_vm3 = vcmask 261312  }
   0x4   :  { %50 = vadd.xlane.f32.xlu1 %v49_v3  ;;  %v40_v11 = vadd.f32 %v24_v9, %v23_v8  ;;  %v124_v12 = vld [vmem:[%s375_s1 + $0x10] sm:$0xff]  ;;  %v125_v13 = vld [vmem:[%s375_s1 + $0x18] sm:$0xff]  ;;  %v123_v15 = vld [vmem:[%s375_s1 + $0x8] sm:$0xff]  ;;  %v75_v57 = vadd.s32 4294967288, %v70_v56  ;;  %v82_v61 = vadd.s32 4294967280, %v70_v56  ;;  %v89_v1 = vadd.s32 4294967272, %v70_v56 }
   0x5   :  { %38 = vadd.xlane.f32.xlu0 %v37_v7  ;;  %v141_v16 = vadd.f32 %v125_v13, %v124_v12  ;;  %v138_v17 = vadd.f32 %v123_v15, %v122_v14  ;;  %v132_v18 = vld [vmem:[%s375_s1 + $0x50] sm:$0xff]  ;;  %v133_v19 = vld [vmem:[%s375_s1 + $0x58] sm:$0xff]  ;;  %v130_v20 = vld [vmem:[%s375_s1 + $0x40] sm:$0xff]  ;;  %v73_v2 = vsub.s32 %v70_v56, %v72_v60  ;;  %vm115_vm4 = vcmask 1041409  }
   0x6   :  { %v131_v21 = vld [vmem:[%s375_s1 + $0x48] sm:$0xff]  ;;  %v153_v22 = vadd.f32 %v133_v19, %v132_v18  ;;  %v33_v24 = vld [vmem:[%s374_s0 + $0x60] sm:$0xff]  ;;  %v35_v36 = vld [vmem:[%s374_s0 + $0x70] sm:$0xff]  ;;  %v78_v62 = vsub.s32 %v75_v57, %v72_v60  ;;  %v85_v3 = vsub.s32 %v82_v61, %v72_v60  ;;  %v92_v8 = vsub.s32 %v89_v1, %v72_v60 }
   0x7   :  { %v150_v23 = vadd.f32 %v131_v21, %v130_v20  ;;  %v34_v25 = vld [vmem:[%s374_s0 + $0x68] sm:$0xff]  ;;  %v25_v26 = vld [vmem:[%s374_s0 + $0x20] sm:$0xff]  ;;  %v36_v37 = vld [vmem:[%s374_s0 + $0x78] sm:$0xff] }
   0x8   :  { %53 = vadd.xlane.f32.xlu1 %v52_v10  ;;  %v26_v27 = vld [vmem:[%s374_s0 + $0x28] sm:$0xff]  ;;  %v55_v28 = vadd.f32 %v34_v25, %v33_v24  ;;  %v134_v30 = vld [vmem:[%s375_s1 + $0x60] sm:$0xff]  ;;  %v27_v38 = vld [vmem:[%s374_s0 + $0x30] sm:$0xff]  ;;  %v58_v40 = vadd.f32 %v36_v37, %v35_v36 }
   0x9   :  { %41 = vadd.xlane.f32.xlu0 %v40_v11  ;;  %v43_v29 = vadd.f32 %v26_v27, %v25_v26  ;;  %v135_v31 = vld [vmem:[%s375_s1 + $0x68] sm:$0xff]  ;;  %v126_v32 = vld [vmem:[%s375_s1 + $0x20] sm:$0xff]  ;;  %v28_v39 = vld [vmem:[%s374_s0 + $0x38] sm:$0xff] }
   0xa   :  { %v127_v33 = vld [vmem:[%s375_s1 + $0x28] sm:$0xff]  ;;  %v156_v34 = vadd.f32 %v135_v31, %v134_v30  ;;  %v46_v41 = vadd.f32 %v28_v39, %v27_v38  ;;  %v136_v42 = vld [vmem:[%s375_s1 + $0x70] sm:$0xff]  ;;  %v137_v43 = vld [vmem:[%s375_s1 + $0x78] sm:$0xff] }
   0xb   :  { %v144_v35 = vadd.f32 %v127_v33, %v126_v32  ;;  %v128_v44 = vld [vmem:[%s375_s1 + $0x30] sm:$0xff]  ;;  %v129_v45 = vld [vmem:[%s375_s1 + $0x38] sm:$0xff]  ;;  %v159_v46 = vadd.f32 %v137_v43, %v136_v42 }
   0xc   :  { %142 = vadd.xlane.f32.xlu1 %v141_v16  ;;  %v147_v47 = vadd.f32 %v129_v45, %v128_v44 }
   0xd   :  { %139 = vadd.xlane.f32.xlu0 %v138_v17 }
  0x10   :  { %154 = vadd.xlane.f32.xlu1 %v153_v22 }
  0x11   :  { %151 = vadd.xlane.f32.xlu0 %v150_v23 }
  0x14   :  { %56 = vadd.xlane.f32.xlu1 %v55_v28  ;;  %v20_v28 = vld [vmem:[%s376_s2] sm:$0x3] }
  0x15   :  { %44 = vadd.xlane.f32.xlu0 %v43_v29 }
  0x18   :  { %157 = vadd.xlane.f32.xlu1 %v156_v34 }
  0x19   :  { %145 = vadd.xlane.f32.xlu0 %v144_v35 }
  0x1c   :  { %59 = vadd.xlane.f32.xlu1 %v58_v40 }
  0x1d   :  { %47 = vadd.xlane.f32.xlu0 %v46_v41  ;;  %v121_v41 = vld [vmem:[%s377_s3] sm:$0x3] }
  0x20   :  { %160 = vadd.xlane.f32.xlu1 %v159_v46 }
  0x21   :  { %148 = vadd.xlane.f32.xlu0 %v147_v47 }
  0x8d   :  { %v51_v49 = vpop.xlane.xlu1 %50 }
  0x8e   :  { %v39_v50 = vpop.xlane.xlu0 %38  ;;  %v99_v9 = vrot.slane %v51_v49, %v73_v2 }
  0x8f   :  { %v74_v10 = vrot.slane %v39_v50, %v73_v2 }
  0x91   :  { %v54_v51 = vpop.xlane.xlu1 %53 }
  0x92   :  { %v42_v52 = vpop.xlane.xlu0 %41  ;;  %v103_v4 = vrot.slane %v54_v51, %v78_v62 }
  0x93   :  { %v79_v5 = vrot.slane %v42_v52, %v78_v62 }
  0x94   :  { %v104_v13 = vsel %vm80_vm1, %v103_v4, %v99_v9 }
  0x95   :  { %v143_v54 = vpop.xlane.xlu1 %142  ;;  %v81_v14 = vsel %vm80_vm1, %v79_v5, %v74_v10 }
  0x96   :  { %v140_v55 = vpop.xlane.xlu0 %139  ;;  %v177_v16 = vrot.slane %v143_v54, %v78_v62 }
  0x97   :  { %v173_v21 = vrot.slane %v140_v55, %v73_v2 }
  0x99   :  { %v155_v58 = vpop.xlane.xlu1 %154  ;;  %v178_v35 = vsel %vm80_vm1, %v177_v16, %v173_v21 }
  0x9a   :  { %v152_v59 = vpop.xlane.xlu0 %151  ;;  %v196_v17 = vrot.slane %v155_v58, %v78_v62 }
  0x9b   :  { %v192_v18 = vrot.slane %v152_v59, %v73_v2 }
  0x9d   :  { %v57_v63 = vpop.xlane.xlu1 %56  ;;  %v197_v31 = vsel %vm80_vm1, %v196_v17, %v192_v18 }
  0x9e   :  { %v45_v0 = vpop.xlane.xlu0 %44  ;;  %v108_v11 = vrot.slane %v57_v63, %v85_v3 }
  0x9f   :  { %v86_v12 = vrot.slane %v45_v0, %v85_v3 }
  0xa0   :  { %v109_v22 = vsel %vm87_vm2, %v108_v11, %v104_v13 }
  0xa1   :  { %v158_v6 = vpop.xlane.xlu1 %157  ;;  %v88_v25 = vsel %vm87_vm2, %v86_v12, %v81_v14 }
  0xa2   :  { %v146_v7 = vpop.xlane.xlu0 %145  ;;  %v201_v23 = vrot.slane %v158_v6, %v85_v3 }
  0xa3   :  { %v182_v26 = vrot.slane %v146_v7, %v85_v3 }
  0xa4   :  { %v202_v36 = vsel %vm87_vm2, %v201_v23, %v197_v31 }
  0xa5   :  { %v60_v15 = vpop.xlane.xlu1 %59  ;;  %v183_v39 = vsel %vm87_vm2, %v182_v26, %v178_v35 }
  0xa6   :  { %v113_v19 = vrot.slane %v60_v15, %v92_v8  ;;  %v48_v20 = vpop.xlane.xlu0 %47 }
  0xa7   :  { %v93_v24 = vrot.slane %v48_v20, %v92_v8 }
  0xa8   :  { %v114_v27 = vsel %vm94_vm3, %v113_v19, %v109_v22 }
  0xa9   :  { %v95_v29 = vsel %vm94_vm3, %v93_v24, %v88_v25  ;;  %v161_v30 = vpop.xlane.xlu1 %160 }
  0xaa   :  { %v116_v32 = vsel %vm115_vm4, %v114_v27, %v95_v29  ;;  %v206_v33 = vrot.slane %v161_v30, %v92_v8  ;;  %v149_v34 = vpop.xlane.xlu0 %148 }
  0xab   :  { %v118_v37 = vadd.f32 %v116_v32, %v20_v28  ;;  %v187_v38 = vrot.slane %v149_v34, %v92_v8 }
  0xac   :  { %v207_v40 = vsel %vm94_vm3, %v206_v33, %v202_v36 }
  0xad   :  { %120 = vst.msk [vmem:[%s376_s2] sm:$0x3] %vm17_vm0, %v118_v37  ;;  %v188_v42 = vsel %vm94_vm3, %v187_v38, %v183_v39 }
  0xae   :  { %v208_v43 = vsel %vm115_vm4, %v207_v40, %v188_v42 }
  0xaf   :  { %v210_v44 = vadd.f32 %v208_v43, %v121_v41 }
  0xb1   :  { %211 = vst.msk [vmem:[%s377_s3] sm:$0x3] %vm17_vm0, %v210_v44 }

// kernel: bica_forward.3
= control target key start
LH: loop header
LB: loop body
LE: loop exit
PB: predicated region body
PF: predicated region fallthrough
CT: control target
= control target key end

     0   :  { %s746_s18 = smov 0   ;;  %s748_s19 = smov 0   ;;  %s807_s0 = inlined_call_operand.vmem [shape: f32[2,32,1], index: 0, kind: input, shape index: {}]   ;;  %s808_s1 = inlined_call_operand.vmem [shape: f32[2,32,1], index: 1, kind: input, shape index: {}]   ;;  %s809_s2 = inlined_call_operand.vmem [shape: f32[2,32,256], index: 2, kind: input, shape index: {}]   ;;  %s810_s3 = inlined_call_operand.vmem [shape: f32[2,32,256], index: 3, kind: input, shape index: {}]   ;;  %s811_s4 = inlined_call_operand.vmem [shape: f32[2,32,256], index: 4, kind: output, shape index: {0}]   ;;  %s812_s5 = inlined_call_operand.vmem [shape: f32[2,32,256], index: 5, kind: output, shape index: {1}]  }
   0x1   :  { %s750_s20 = smov 0  }
   0x2 LB: > { %s28_s21 = sadd.s32 1, %s709_s19  ;;  %p643_p0 = scmp.ge.s32.totalorder %s713_s20, 1  ;;  %s713_s20 = sphi %s750_s20, %s16_s20   ;;  %s709_s19 = sphi %s748_s19, %s814_s19   ;;  %s705_s18 = sphi %s746_s18, %s813_s18  }
   0x3   : > { %p30_p1 = scmp.ge.s32.totalorder %s28_s21, 2  ;;  %p250_p2 = scmp.lt.s32.totalorder %s713_s20, 3 }
   0x5   : > { %s816_s21 = smov (%p30_p1, %s28_s21), 0  ;;  %p251_p3 = pnand %p643_p0, %p250_p2 }
   0x6   : > { %p314_p4 = scmp.lt.s32.totalorder (!%p251_p3), %s705_s18, 1 }
   0x7   : > { %254 = sbr.rel (%p251_p3) target bundleno = 156 (0x9c), region = 36 }
   0xc   : > { %v715_v0 = vmov 0   ;;  %s818_s18 = smov (!%p314_p4, %s705_s18), 1 }
   0xd   : > { %690 = vset.pattern.permute.xlu1 %v715_v0  ;;  %689 = vset.pattern.permute.xlu0 %v715_v0  ;;  %s658_s22 = sshll.u32 %s818_s18, 5  ;;  %s770_s29 = sshll.u32 %s818_s18, 6 }
   0xe   : > { %s318_s25 = scalar_lea.vmem %s807_s0, %s658_s22  ;;  %s323_s28 = scalar_lea.vmem %s808_s1, %s658_s22 }
   0xf   : > { %v374_v1 = vld [vmem:[%s318_s25 + $0x10] sm:$0xff]  ;;  %v372_v2 = vld [vmem:[%s318_s25] sm:$0xff]  ;;  %v375_v3 = vld [vmem:[%s318_s25 + $0x18] sm:$0xff]  ;;  %s332_s7 = scalar_lea.vmem %s809_s2, %s770_s29  ;;  %s352_s10 = scalar_lea.vmem %s811_s4, %s770_s29 }
  0x10   : > { %388 = vperm.xlu1 %690, %v374_v1   ;;  %378 = vperm.xlu0 %689, %v372_v2   ;;  %v373_v4 = vld [vmem:[%s318_s25 + $0x8] sm:$0xff]  ;;  %v420_v6 = vld [vmem:[%s323_s28] sm:$0xff]  ;;  %v423_v7 = vld [vmem:[%s323_s28 + $0x18] sm:$0xff]  ;;  %s784_s13 = scalar_lea.vmem %s810_s3, %s770_s29  ;;  %s362_s16 = scalar_lea.vmem %s812_s5, %s770_s29 }
  0x11   : > { %v421_v5 = vld [vmem:[%s323_s28 + $0x8] sm:$0xff]  ;;  %v422_v8 = vld [vmem:[%s323_s28 + $0x10] sm:$0xff]  ;;  %v368_v9 = vld [vmem:[%s332_s7 + $0x20] sm:$0xff] }
  0x12   : > { %v369_v10 = vld [vmem:[%s332_s7 + $0x28] sm:$0xff]  ;;  %v364_v11 = vld [vmem:[%s332_s7] sm:$0xff]  ;;  %v370_v19 = vld [vmem:[%s332_s7 + $0x30] sm:$0xff] }
  0x13   : > { %v365_v12 = vld [vmem:[%s332_s7 + $0x8] sm:$0xff]  ;;  %v371_v20 = vld [vmem:[%s332_s7 + $0x38] sm:$0xff]  ;;  %v366_v21 = vld [vmem:[%s332_s7 + $0x10] sm:$0xff] }
  0x14   : > { %393 = vperm.xlu1 %690, %v375_v3   ;;  %383 = vperm.xlu0 %689, %v373_v4   ;;  %v367_v22 = vld [vmem:[%s332_s7 + $0x18] sm:$0xff]  ;;  %v414_v29 = vld [vmem:[%s784_s13 + $0x10] sm:$0xff]  ;;  %v412_v31 = vld [vmem:[%s784_s13] sm:$0xff] }
  0x15   : > { %v415_v30 = vld [vmem:[%s784_s13 + $0x18] sm:$0xff]  ;;  %v413_v32 = vld [vmem:[%s784_s13 + $0x8] sm:$0xff]  ;;  %v418_v39 = vld [vmem:[%s784_s13 + $0x30] sm:$0xff] }
  0x16   : > { %v419_v40 = vld [vmem:[%s784_s13 + $0x38] sm:$0xff]  ;;  %v416_v41 = vld [vmem:[%s784_s13 + $0x20] sm:$0xff]  ;;  %v417_v42 = vld [vmem:[%s784_s13 + $0x28] sm:$0xff] }
  0x18   : > { %431 = vperm.xlu1 %690, %v421_v5   ;;  %426 = vperm.xlu0 %689, %v420_v6  }
  0x1c   : > { %441 = vperm.xlu1 %690, %v423_v7   ;;  %436 = vperm.xlu0 %689, %v422_v8  }
  0x8b   : > { %v389_v13 = vpop.permute.xlu1 %388  ;;  %v379_v14 = vpop.permute.xlu0 %378 }
  0x8c   : > { %v400_v15 = vmul.f32 %v389_v13, %v368_v9  ;;  %v401_v16 = vmul.f32 %v389_v13, %v369_v10  ;;  %v396_v17 = vmul.f32 %v379_v14, %v364_v11  ;;  %v397_v18 = vmul.f32 %v379_v14, %v365_v12 }
  0x8e   : > { %408 = vst [vmem:[%s352_s10 + $0x20] sm:$0xff] %v400_v15  ;;  %409 = vst [vmem:[%s352_s10 + $0x28] sm:$0xff] %v401_v16 }
  0x8f   : > { %404 = vst [vmem:[%s352_s10] sm:$0xff] %v396_v17  ;;  %405 = vst [vmem:[%s352_s10 + $0x8] sm:$0xff] %v397_v18  ;;  %v394_v23 = vpop.permute.xlu1 %393  ;;  %v384_v24 = vpop.permute.xlu0 %383 }
  0x90   : > { %v402_v25 = vmul.f32 %v394_v23, %v370_v19  ;;  %v403_v26 = vmul.f32 %v394_v23, %v371_v20  ;;  %v398_v27 = vmul.f32 %v384_v24, %v366_v21  ;;  %v399_v28 = vmul.f32 %v384_v24, %v367_v22 }
  0x92   : > { %410 = vst [vmem:[%s352_s10 + $0x30] sm:$0xff] %v402_v25  ;;  %411 = vst [vmem:[%s352_s10 + $0x38] sm:$0xff] %v403_v26 }
  0x93   : > { %406 = vst [vmem:[%s352_s10 + $0x10] sm:$0xff] %v398_v27  ;;  %407 = vst [vmem:[%s352_s10 + $0x18] sm:$0xff] %v399_v28  ;;  %v432_v33 = vpop.permute.xlu1 %431  ;;  %v427_v34 = vpop.permute.xlu0 %426 }
  0x94   : > { %v446_v35 = vmul.f32 %v432_v33, %v414_v29  ;;  %v447_v36 = vmul.f32 %v432_v33, %v415_v30  ;;  %v444_v37 = vmul.f32 %v427_v34, %v412_v31  ;;  %v445_v38 = vmul.f32 %v427_v34, %v413_v32 }
  0x96   : > { %454 = vst [vmem:[%s362_s16 + $0x10] sm:$0xff] %v446_v35  ;;  %455 = vst [vmem:[%s362_s16 + $0x18] sm:$0xff] %v447_v36 }
  0x97   : > { %452 = vst [vmem:[%s362_s16] sm:$0xff] %v444_v37  ;;  %453 = vst [vmem:[%s362_s16 + $0x8] sm:$0xff] %v445_v38  ;;  %v442_v43 = vpop.permute.xlu1 %441  ;;  %v437_v44 = vpop.permute.xlu0 %436 }
  0x98   : > { %v450_v45 = vmul.f32 %v442_v43, %v418_v39  ;;  %v451_v46 = vmul.f32 %v442_v43, %v419_v40  ;;  %v448_v47 = vmul.f32 %v437_v44, %v416_v41  ;;  %v449_v48 = vmul.f32 %v437_v44, %v417_v42 }
  0x9a   : > { %458 = vst [vmem:[%s362_s16 + $0x30] sm:$0xff] %v450_v45  ;;  %459 = vst [vmem:[%s362_s16 + $0x38] sm:$0xff] %v451_v46 }
  0x9b   : > { %456 = vst [vmem:[%s362_s16 + $0x20] sm:$0xff] %v448_v47  ;;  %457 = vst [vmem:[%s362_s16 + $0x28] sm:$0xff] %v449_v48 }
  0x9c PF: > { %s16_s20 = sadd.s32 1, %s713_s20   ;;  %s813_s18 = smov %s709_s19 }
  0x9d   : > { %p13_p5 = scmp.ge.s32.totalorder %s16_s20, 4   ;;  %s814_s19 = smov %s816_s21 }
  0x9f   :  { %15 = sbr.rel (!%p13_p5) target bundleno = 2 (0x2), region = 87 }

</bundles_post_ra>
